<compile_context>
chip_gen: v7x
topology: tpu7x:2x2x1
jax: 0.10.0
libtpu: 0.0.40
codegen_flags: <defaults>
</compile_context>

<pallas_src>
import functools

import jax
import jax.numpy as jnp
import numpy as np
from jax import lax
from jax.experimental import pallas as pl
from jax.experimental.pallas import tpu as pltpu

EPS = 1e-5  # PyTorch BatchNorm2d default.


def _relation_kernel(x_ref, w12_ref, aux_ref, o_ref, *, n, ss, ss_pad, c):
    f32 = jnp.float32
    rp = x_ref.shape[0]          # n * ss_pad (per-sample padded rows)
    c2 = 2 * c
    rows = n * ss                # real (unpadded) row count

    # --- static slices of the coalesced operands -------------------------
    w1 = w12_ref[0:c2, :]                      # (2C, C) bf16
    w2 = w12_ref[c2:c2 + c, :]                 # (C,  C) bf16
    w3p = aux_ref[0:ss_pad, :]                 # (SS_PAD, C) f32, zero on pad rows
    g1 = aux_ref[ss_pad + 0:ss_pad + 1, :]
    be1 = aux_ref[ss_pad + 1:ss_pad + 2, :]
    g2 = aux_ref[ss_pad + 2:ss_pad + 3, :]
    be2 = aux_ref[ss_pad + 3:ss_pad + 4, :]
    b3 = aux_ref[ss_pad + 4:ss_pad + 5, 0:1]   # (1, 1)

    # Masked mean weights: 1/rows on real rows, 0 on per-sample padding rows,
    # so both BN layers compute batch statistics over exactly the real rows.
    ridx = lax.broadcasted_iota(jnp.int32, (1, rp), 1)
    in_sample = (ridx % ss_pad) < ss
    inv_row = jnp.where(in_sample, 1.0 / rows, 0.0).astype(f32)           # (1, Rp)

    def bn_relu(y, g, be):
        # Train-mode BN (batch stats, biased variance). E[y] and E[y^2] come
        # from ONE MXU dot against the lane-concatenated [y | y*y] (2C <= 128
        # lanes, so the concat stays inside one vreg and the XLU is idle).
        # NOTE: var = E[y^2] - mu^2 can cancel when |mu| >> sigma; fine at
        # this activation scale, switch to a shifted / two-pass form at scale.
        yy = jnp.concatenate([y, y * y], axis=1)                          # (Rp, 2C)
        stats = jnp.dot(inv_row, yy, preferred_element_type=f32)          # (1, 2C)
        mu, ex2 = stats[:, :c], stats[:, c:]
        var = ex2 - mu * mu
        scale = lax.rsqrt(var + EPS) * g
        shift = be - mu * scale
        return jnp.maximum(y * scale + shift, 0.0)

    # ---- layer1: 1x1 conv == channel matmul (bf16 MXU, f32 accumulate).
    # Conv bias dropped: cancelled exactly by the train-mode BN mean subtract.
    y = jnp.dot(x_ref[...], w1, preferred_element_type=f32)               # (Rp, C)
    y = bn_relu(y, g1, be1)

    # ---- layer2: same structure.
    z = jnp.dot(y.astype(jnp.bfloat16), w2, preferred_element_type=f32)
    z = bn_relu(z, g2, be2)                                               # (Rp, C)

    # ---- layer3: SxS "valid" conv over the full spatial extent -> (N, 1).
    # Broadcast the (SS_PAD, C) weight across the batch with an aligned
    # sublane concat (no batch-tiled HBM operand), then reduce in the cheap
    # order: per-row channel sum (Rp*C MACs) followed by per-sample pooling
    # (N*Rp MACs) built from iota — no extra HBM inputs.
    w3b = jnp.concatenate([w3p] * n, axis=0)                              # (Rp, C)
    s = z * w3b                                                           # (Rp, C)
    u = jnp.dot(s, jnp.ones((c, 1), f32), preferred_element_type=f32)     # (Rp, 1)
    rr = lax.broadcasted_iota(jnp.int32, (n, rp), 1)
    nn = lax.broadcasted_iota(jnp.int32, (n, rp), 0)
    lo = nn * ss_pad
    pool = jnp.where((rr >= lo) & (rr < lo + ss), 1.0, 0.0).astype(f32)   # (N, Rp)
    r = jnp.dot(pool, u, preferred_element_type=f32) + b3                 # (N, 1)
    # (N,1) masked store is negligible at this N; switch to a lane-major (1,N)
    # output if N grows.
    o_ref[...] = jax.nn.sigmoid(r)


def _vmem_limit_bytes(operand_bytes, scratch_bytes):
    """Generation-aware VMEM cap: 75% of physical VMEM (48 MiB v7x, 96 MiB v5e/v6e)."""
    try:
        phys = int(pltpu.get_tpu_info().vmem_capacity_bytes)
    except Exception:
        phys = 64 << 20  # conservative fallback: v7x per-TensorCore size
    cap = max(16 << 20, (phys * 3) // 4)
    want = 4 * (operand_bytes + scratch_bytes)  # generous headroom for Mosaic temps
    return int(min(cap, max(16 << 20, want)))


def relation_network_pallas(x_nchw, params, sample_size):
    N, C2, H, W = x_nchw.shape
    assert H == sample_size and W == sample_size, "layer3 kernel covers the full spatial extent"
    C = C2 // 2
    SS = H * W
    SS_PAD = ((SS + 15) // 16) * 16   # per-sample row stride, bf16 sublane aligned
    RP = N * SS_PAD

    w1_conv, b1, g1, be1, w2_conv, b2, g2, be2, w3_conv, b3 = params
    del b1, b2  # pre-BN conv biases are redundant under train-mode BN

    # NCHW -> rows (n, h, w), channels last, padded per-sample to SS_PAD rows.
    # Cast to bf16 before the transpose so the copy moves half the bytes.
    x_rows = jnp.transpose(x_nchw.astype(jnp.bfloat16), (0, 2, 3, 1)).reshape(N, SS, C2)
    x_rows = jnp.pad(x_rows, ((0, 0), (0, SS_PAD - SS), (0, 0)))
    x2d = x_rows.reshape(RP, C2)

    # Coalesced bf16 matmul weights: rows [0, 2C) = W1, rows [2C, 3C) = W2.
    w1 = jnp.transpose(w1_conv[:, :, 0, 0], (1, 0))                       # (2C, C)
    w2 = jnp.transpose(w2_conv[:, :, 0, 0], (1, 0))                       # (C, C)
    w12 = jnp.concatenate([w1, w2], axis=0).astype(jnp.bfloat16)          # (3C, C)

    # Coalesced f32 aux slab: rows [0, SS_PAD) = layer3 weight in (h, w) row
    # order (zero on pad rows), then g1, be1, g2, be2, broadcast(b3).
    w3_mat = jnp.transpose(w3_conv[0], (1, 2, 0)).reshape(SS, C)
    w3p = jnp.pad(w3_mat, ((0, SS_PAD - SS), (0, 0)))
    bn_rows = jnp.stack([g1, be1, g2, be2, jnp.broadcast_to(b3, (C,))], axis=0)
    aux = jnp.concatenate([w3p, bn_rows], axis=0).astype(jnp.float32)     # (SS_PAD+5, C)

    operand_bytes = sum(int(a.size) * a.dtype.itemsize for a in (x2d, w12, aux)) + 4 * N
    scratch_bytes = 8 * RP * C * 4   # y, z, [y|y*y], s style f32 temporaries
    vmem_limit = _vmem_limit_bytes(operand_bytes, scratch_bytes)

    kernel = functools.partial(_relation_kernel, n=N, ss=SS, ss_pad=SS_PAD, c=C)
    out = pl.pallas_call(
        kernel,
        out_shape=jax.ShapeDtypeStruct((N, 1), jnp.float32),
        compiler_params=pltpu.CompilerParams(vmem_limit_bytes=vmem_limit),
    )(x2d, w12, aux)
    return out


def relation_network_ref(x_nchw, params, sample_size):
    """Pure-JAX reference mirroring the PyTorch (train-mode) forward in NCHW."""
    w1, b1, g1, be1, w2, b2, g2, be2, w3, b3 = params
    dn = ("NCHW", "OIHW", "NCHW")

    def bn_relu(y, g, be):
        mu = jnp.mean(y, axis=(0, 2, 3), keepdims=True)
        var = jnp.mean((y - mu) ** 2, axis=(0, 2, 3), keepdims=True)
        yh = (y - mu) * lax.rsqrt(var + EPS)
        yh = yh * g.reshape(1, -1, 1, 1) + be.reshape(1, -1, 1, 1)
        return jnp.maximum(yh, 0.0)

    out = lax.conv_general_dilated(x_nchw, w1, (1, 1), "VALID", dimension_numbers=dn)
    out = out + b1.reshape(1, -1, 1, 1)
    out = bn_relu(out, g1, be1)
    out = lax.conv_general_dilated(out, w2, (1, 1), "VALID", dimension_numbers=dn)
    out = out + b2.reshape(1, -1, 1, 1)
    out = bn_relu(out, g2, be2)
    out = lax.conv_general_dilated(out, w3, (1, 1), "VALID", dimension_numbers=dn)
    out = out + b3.reshape(1, -1, 1, 1)
    out = out.reshape(out.shape[0], -1)
    return jax.nn.sigmoid(out)


def init_params(key, feature_dim, sample_size):
    C = feature_dim
    ks = jax.random.split(key, 6)
    w1 = jax.random.normal(ks[0], (C, 2 * C, 1, 1), jnp.float32) * 0.1
    b1 = jax.random.normal(ks[1], (C,), jnp.float32) * 0.1
    g1 = jnp.ones((C,), jnp.float32)     # BatchNorm affine init (PyTorch default)
    be1 = jnp.zeros((C,), jnp.float32)
    w2 = jax.random.normal(ks[2], (C, C, 1, 1), jnp.float32) * 0.1
    b2 = jax.random.normal(ks[3], (C,), jnp.float32) * 0.1
    g2 = jnp.ones((C,), jnp.float32)
    be2 = jnp.zeros((C,), jnp.float32)
    w3 = jax.random.normal(ks[4], (1, C, sample_size, sample_size), jnp.float32) * 0.1
    b3 = jax.random.normal(ks[5], (1,), jnp.float32) * 0.1
    return (w1, b1, g1, be1, w2, b2, g2, be2, w3, b3)


if __name__ == "__main__":
    N = 4
    feature_dim = 32
    sample_size = 5

    key = jax.random.PRNGKey(0)
    kx, kp = jax.random.split(key)
    x = jax.random.normal(kx, (N, 2 * feature_dim, sample_size, sample_size), jnp.float32)
    params = init_params(kp, feature_dim, sample_size)

    out = jax.block_until_ready(relation_network_pallas(x, params, sample_size))
    ref = jax.block_until_ready(relation_network_ref(x, params, sample_size))

    assert out.shape == (N, 1), out.shape
    # bf16 matmul inputs (with f32 accumulation / f32 BN stats) vs. the all-f32
    # reference give ~1e-3 level differences in the sigmoid output.
    assert np.allclose(np.asarray(out), np.asarray(ref), atol=2e-2, rtol=2e-2), (
        np.max(np.abs(np.asarray(out) - np.asarray(ref))))

    print("KERNEL_OK")
</pallas_src>

<mosaic_0001>
module attributes {stable_mosaic.version = 11 : i64} {
  func.func @_relation_kernel(%arg0: memref<128x64xbf16, #tpu.memory_space<vmem>>, %arg1: memref<96x32xbf16, #tpu.memory_space<vmem>>, %arg2: memref<37x32xf32, #tpu.memory_space<vmem>>, %arg3: memref<4x1xf32, #tpu.memory_space<vmem>>) attributes {dimension_semantics = [], scalar_prefetch = 0 : i64, scratch_operands = 0 : i64, tpu.core_type = #tpu.core_type<tc>} {
    %c0 = arith.constant 0 : index
    %c0_0 = arith.constant 0 : index
    %0 = vector.load %arg1[%c0, %c0_0] : memref<96x32xbf16, #tpu.memory_space<vmem>>, vector<64x32xbf16>
    %c64 = arith.constant 64 : index
    %c0_1 = arith.constant 0 : index
    %1 = vector.load %arg1[%c64, %c0_1] : memref<96x32xbf16, #tpu.memory_space<vmem>>, vector<32x32xbf16>
    %c0_2 = arith.constant 0 : index
    %c0_3 = arith.constant 0 : index
    %2 = vector.load %arg2[%c0_2, %c0_3] : memref<37x32xf32, #tpu.memory_space<vmem>>, vector<32x32xf32>
    %c32 = arith.constant 32 : index
    %c0_4 = arith.constant 0 : index
    %3 = vector.load %arg2[%c32, %c0_4] : memref<37x32xf32, #tpu.memory_space<vmem>>, vector<1x32xf32>
    %c33 = arith.constant 33 : index
    %c0_5 = arith.constant 0 : index
    %4 = vector.load %arg2[%c33, %c0_5] : memref<37x32xf32, #tpu.memory_space<vmem>>, vector<1x32xf32>
    %c34 = arith.constant 34 : index
    %c0_6 = arith.constant 0 : index
    %5 = vector.load %arg2[%c34, %c0_6] : memref<37x32xf32, #tpu.memory_space<vmem>>, vector<1x32xf32>
    %c35 = arith.constant 35 : index
    %c0_7 = arith.constant 0 : index
    %6 = vector.load %arg2[%c35, %c0_7] : memref<37x32xf32, #tpu.memory_space<vmem>>, vector<1x32xf32>
    %c36 = arith.constant 36 : index
    %c0_8 = arith.constant 0 : index
    %7 = vector.load %arg2[%c36, %c0_8] : memref<37x32xf32, #tpu.memory_space<vmem>>, vector<1x1xf32>
    %8 = tpu.iota {dimensions = array<i32: 1>} : vector<1x128xi32>
    %c32_i32 = arith.constant 32 : i32
    %c0_i32 = arith.constant 0 : i32
    %9 = arith.cmpi eq, %c32_i32, %c0_i32 : i32
    %c1_i32 = arith.constant 1 : i32
    %10 = arith.select %9, %c1_i32, %c32_i32 : i32
    %11 = vector.broadcast %10 : i32 to vector<1x128xi32>
    %12 = arith.remsi %8, %11 : vector<1x128xi32>
    %c0_i32_9 = arith.constant 0 : i32
    %13 = vector.broadcast %c0_i32_9 : i32 to vector<1x128xi32>
    %14 = arith.cmpi ne, %12, %13 : vector<1x128xi32>
    %c0_i32_10 = arith.constant 0 : i32
    %15 = vector.broadcast %c0_i32_10 : i32 to vector<1x128xi32>
    %16 = arith.cmpi slt, %12, %15 : vector<1x128xi32>
    %c0_i32_11 = arith.constant 0 : i32
    %17 = arith.cmpi slt, %10, %c0_i32_11 : i32
    %18 = vector.broadcast %17 : i1 to vector<1x128xi1>
    %19 = vector.broadcast %18 : vector<1x128xi1> to vector<1x128xi1>
    %20 = arith.xori %16, %19 : vector<1x128xi1>
    %21 = arith.andi %20, %14 : vector<1x128xi1>
    %22 = vector.broadcast %10 : i32 to vector<1x128xi32>
    %23 = arith.addi %12, %22 : vector<1x128xi32>
    %24 = arith.select %21, %23, %12 : vector<1x128xi1>, vector<1x128xi32>
    %c25_i32 = arith.constant 25 : i32
    %25 = vector.broadcast %c25_i32 : i32 to vector<1x128xi32>
    %26 = arith.cmpi slt, %24, %25 : vector<1x128xi32>
    %cst = arith.constant 0.00999999977 : f32
    %cst_12 = arith.constant 0.000000e+00 : f32
    %27 = vector.broadcast %cst : f32 to vector<1x128xf32>
    %28 = vector.broadcast %cst_12 : f32 to vector<1x128xf32>
    %29 = arith.select %26, %27, %28 : vector<1x128xi1>, vector<1x128xf32>
    %c0_13 = arith.constant 0 : index
    %c0_14 = arith.constant 0 : index
    %30 = vector.load %arg0[%c0_13, %c0_14] : memref<128x64xbf16, #tpu.memory_space<vmem>>, vector<128x64xbf16>
    %cst_15 = arith.constant dense<0.000000e+00> : vector<128x32xf32>
    %31 = tpu.matmul %30, %0, %cst_15 {dimension_numbers = #tpu.dot_dimension_numbers<[1], [0], [0], [1], [0, 0, 1, 1], [], []>} : vector<128x64xbf16>, vector<64x32xbf16>, vector<128x32xf32> -> vector<128x32xf32>
    %32 = arith.mulf %31, %31 : vector<128x32xf32>
    %33 = tpu.concatenate %31, %32 in 1 : vector<128x32xf32>, vector<128x32xf32> -> vector<128x64xf32>
    %cst_16 = arith.constant dense<0.000000e+00> : vector<1x64xf32>
    %34 = tpu.matmul %29, %33, %cst_16 {dimension_numbers = #tpu.dot_dimension_numbers<[1], [0], [0], [1], [0, 0, 1, 1], [], []>} : vector<1x128xf32>, vector<128x64xf32>, vector<1x64xf32> -> vector<1x64xf32>
    %35 = vector.extract_strided_slice %34 {offsets = [0, 0], sizes = [1, 32], strides = [1, 1]} : vector<1x64xf32> to vector<1x32xf32>
    %36 = vector.extract_strided_slice %34 {offsets = [0, 32], sizes = [1, 32], strides = [1, 1]} : vector<1x64xf32> to vector<1x32xf32>
    %37 = arith.mulf %35, %35 : vector<1x32xf32>
    %38 = arith.subf %36, %37 : vector<1x32xf32>
    %cst_17 = arith.constant 9.99999974E-6 : f32
    %39 = vector.broadcast %cst_17 : f32 to vector<1x32xf32>
    %40 = arith.addf %38, %39 : vector<1x32xf32>
    %41 = math.rsqrt %40 : vector<1x32xf32>
    %42 = arith.mulf %41, %3 : vector<1x32xf32>
    %43 = arith.mulf %35, %42 : vector<1x32xf32>
    %44 = arith.subf %4, %43 : vector<1x32xf32>
    %45 = vector.broadcast %42 : vector<1x32xf32> to vector<128x32xf32>
    %46 = arith.mulf %31, %45 : vector<128x32xf32>
    %47 = vector.broadcast %44 : vector<1x32xf32> to vector<128x32xf32>
    %48 = arith.addf %46, %47 : vector<128x32xf32>
    %cst_18 = arith.constant 0.000000e+00 : f32
    %49 = vector.broadcast %cst_18 : f32 to vector<128x32xf32>
    %50 = arith.maximumf %48, %49 : vector<128x32xf32>
    %51 = arith.truncf %50 : vector<128x32xf32> to vector<128x32xbf16>
    %cst_19 = arith.constant dense<0.000000e+00> : vector<128x32xf32>
    %52 = tpu.matmul %51, %1, %cst_19 {dimension_numbers = #tpu.dot_dimension_numbers<[1], [0], [0], [1], [0, 0, 1, 1], [], []>} : vector<128x32xbf16>, vector<32x32xbf16>, vector<128x32xf32> -> vector<128x32xf32>
    %53 = arith.mulf %52, %52 : vector<128x32xf32>
    %54 = tpu.concatenate %52, %53 in 1 : vector<128x32xf32>, vector<128x32xf32> -> vector<128x64xf32>
    %cst_20 = arith.constant dense<0.000000e+00> : vector<1x64xf32>
    %55 = tpu.matmul %29, %54, %cst_20 {dimension_numbers = #tpu.dot_dimension_numbers<[1], [0], [0], [1], [0, 0, 1, 1], [], []>} : vector<1x128xf32>, vector<128x64xf32>, vector<1x64xf32> -> vector<1x64xf32>
    %56 = vector.extract_strided_slice %55 {offsets = [0, 0], sizes = [1, 32], strides = [1, 1]} : vector<1x64xf32> to vector<1x32xf32>
    %57 = vector.extract_strided_slice %55 {offsets = [0, 32], sizes = [1, 32], strides = [1, 1]} : vector<1x64xf32> to vector<1x32xf32>
    %58 = arith.mulf %56, %56 : vector<1x32xf32>
    %59 = arith.subf %57, %58 : vector<1x32xf32>
    %cst_21 = arith.constant 9.99999974E-6 : f32
    %60 = vector.broadcast %cst_21 : f32 to vector<1x32xf32>
    %61 = arith.addf %59, %60 : vector<1x32xf32>
    %62 = math.rsqrt %61 : vector<1x32xf32>
    %63 = arith.mulf %62, %5 : vector<1x32xf32>
    %64 = arith.mulf %56, %63 : vector<1x32xf32>
    %65 = arith.subf %6, %64 : vector<1x32xf32>
    %66 = vector.broadcast %63 : vector<1x32xf32> to vector<128x32xf32>
    %67 = arith.mulf %52, %66 : vector<128x32xf32>
    %68 = vector.broadcast %65 : vector<1x32xf32> to vector<128x32xf32>
    %69 = arith.addf %67, %68 : vector<128x32xf32>
    %cst_22 = arith.constant 0.000000e+00 : f32
    %70 = vector.broadcast %cst_22 : f32 to vector<128x32xf32>
    %71 = arith.maximumf %69, %70 : vector<128x32xf32>
    %72 = tpu.concatenate %2, %2, %2, %2 in 0 : vector<32x32xf32>, vector<32x32xf32>, vector<32x32xf32>, vector<32x32xf32> -> vector<128x32xf32>
    %73 = arith.mulf %71, %72 : vector<128x32xf32>
    %cst_23 = arith.constant 1.000000e+00 : f32
    %74 = vector.broadcast %cst_23 : f32 to vector<32x1xf32>
    %cst_24 = arith.constant dense<0.000000e+00> : vector<128x1xf32>
    %75 = tpu.matmul %73, %74, %cst_24 {dimension_numbers = #tpu.dot_dimension_numbers<[1], [0], [0], [1], [0, 0, 1, 1], [], []>} : vector<128x32xf32>, vector<32x1xf32>, vector<128x1xf32> -> vector<128x1xf32>
    %76 = tpu.iota {dimensions = array<i32: 1>} : vector<4x128xi32>
    %77 = tpu.iota {dimensions = array<i32: 0>} : vector<4x128xi32>
    %c32_i32_25 = arith.constant 32 : i32
    %78 = vector.broadcast %c32_i32_25 : i32 to vector<4x128xi32>
    %79 = arith.muli %77, %78 : vector<4x128xi32>
    %80 = arith.cmpi sge, %76, %79 : vector<4x128xi32>
    %c25_i32_26 = arith.constant 25 : i32
    %81 = vector.broadcast %c25_i32_26 : i32 to vector<4x128xi32>
    %82 = arith.addi %79, %81 : vector<4x128xi32>
    %83 = arith.cmpi slt, %76, %82 : vector<4x128xi32>
    %84 = arith.andi %80, %83 : vector<4x128xi1>
    %cst_27 = arith.constant 1.000000e+00 : f32
    %cst_28 = arith.constant 0.000000e+00 : f32
    %85 = vector.broadcast %cst_27 : f32 to vector<4x128xf32>
    %86 = vector.broadcast %cst_28 : f32 to vector<4x128xf32>
    %87 = arith.select %84, %85, %86 : vector<4x128xi1>, vector<4x128xf32>
    %cst_29 = arith.constant dense<0.000000e+00> : vector<4x1xf32>
    %88 = tpu.matmul %87, %75, %cst_29 {dimension_numbers = #tpu.dot_dimension_numbers<[1], [0], [0], [1], [0, 0, 1, 1], [], []>} : vector<4x128xf32>, vector<128x1xf32>, vector<4x1xf32> -> vector<4x1xf32>
    %89 = vector.broadcast %7 : vector<1x1xf32> to vector<4x1xf32>
    %90 = arith.addf %88, %89 : vector<4x1xf32>
    %91 = arith.negf %90 : vector<4x1xf32>
    %92 = math.exp %91 : vector<4x1xf32>
    %cst_30 = arith.constant 1.000000e+00 : f32
    %93 = vector.broadcast %cst_30 : f32 to vector<4x1xf32>
    %94 = arith.addf %93, %92 : vector<4x1xf32>
    %95 = arith.divf %93, %94 : vector<4x1xf32>
    %c0_31 = arith.constant 0 : index
    %c0_32 = arith.constant 0 : index
    %96 = vector.load %arg3[%c0_31, %c0_32] : memref<4x1xf32, #tpu.memory_space<vmem>>, vector<4x1xf32>
    tpu.vector_store %arg3[%c0_31, %c0_32], %95 {strides = array<i32>} : memref<4x1xf32, #tpu.memory_space<vmem>>, vector<4x1xf32>,
    return
  }
}

</mosaic_0001>

<bundles_post_ra>
// kernel: tpu_custom_call.1
= control target key start
LH: loop header
LB: loop body
LE: loop exit
PB: predicated region body
PF: predicated region fallthrough
CT: control target
= control target key end

     0   :  { %vm132_vm0 = vcmask 523264   ;;  %v1700_v12 = vmov 0.0|0.0   ;;  %vm1702_vm1 = vmmov 0   ;;  %v1703_v52 = vmov 0.0   ;;  %s1705_s15 = smov 96   ;;  %s2141_s1 = inlined_call_operand.vmem [shape: bf16[96,32], index: 1, kind: input, shape index: {}]   ;;  %s2142_s0 = inlined_call_operand.vmem [shape: bf16[128,64], index: 0, kind: input, shape index: {}]   ;;  %s2143_s2 = inlined_call_operand.vmem [shape: f32[37,32], index: 2, kind: input, shape index: {}]   ;;  %s2144_s3 = inlined_call_operand.vmem [shape: f32[4,1], index: 3, kind: output, shape index: {}]  }
   0x1   :  { %v1678_v0 = vld [vmem:[%s2141_s1] sm:$0xff]   ;;  %v1679_v1 = vld [vmem:[%s2141_s1 + $0x8] sm:$0xff]   ;;  %v1680_v2 = vld [vmem:[%s2141_s1 + $0x10] sm:$0xff]   ;;  %1514 = vmatprep.subr.bf16.mxu1 %v1700_v12  ;;  %1389 = vmatprep.mubr.msk.f32.mxu1 %vm1702_vm1, %v1703_v52  ;;  %vm334_vm2 = vcmask 261120   ;;  %vm1183_vm7 = vcmask 3072  }
   0x2   :  { %1333 = vmatprep.subr.bf16.mxu0 %v1678_v0  ;;  %v1682_v3 = vld [vmem:[%s2142_s0] sm:$0xff]   ;;  %v1681_v4 = vld [vmem:[%s2141_s1 + $0x18] sm:$0xff]   ;;  %v1683_v5 = vld [vmem:[%s2142_s0 + $0x8] sm:$0xff]  }
   0x3   :  { %1334 = vmatpush3.bf16.msra.mxu0 %v1678_v0  ;;  %1341 = vmatprep.mubr.msk.bf16.mxu0 %vm132_vm0, %v1682_v3  ;;  %v1684_v6 = vld [vmem:[%s2142_s0 + $0x10] sm:$0xff]   ;;  %v1685_v7 = vld [vmem:[%s2142_s0 + $0x18] sm:$0xff]   ;;  %v1686_v8 = vld [vmem:[%s2142_s0 + $0x20] sm:$0xff]  }
   0x4   :  { %1335 = vmatprep.subr.bf16.mxu0 %v1679_v1  ;;  %v1687_v9 = vld [vmem:[%s2142_s0 + $0x28] sm:$0xff]   ;;  %v1688_v10 = vld [vmem:[%s2142_s0 + $0x30] sm:$0xff]   ;;  %v1689_v11 = vld [vmem:[%s2142_s0 + $0x38] sm:$0xff]   ;;  %s1701_s0 = smov 32  }
   0x7   :  { %1336 = vmatpush3.bf16.msra.mxu0 %v1679_v1 }
   0x8   :  { %1337 = vmatprep.subr.bf16.mxu0 %v1680_v2 }
   0xb   :  { %1338 = vmatpush3.bf16.msra.mxu0 %v1680_v2 }
   0xc   :  { %1339 = vmatprep.subr.bf16.mxu0 %v1681_v4 }
   0xf   :  { %1340 = vmatpush3.bf16.msra.mxu0 %v1681_v4 }
  0x10   :  { %1538 = vmatprep.subr.bf16.mxu0 %v1700_v12 }
  0x12   :  { %1342 = vmatmul.mubr.msk.bf16.vlgmr.msra.gmra.mrb[0].mxu0 %vm132_vm0, %v1683_v5 }
  0x13   :  { %1345 = vmatprep.mubr.msk.bf16.mxu0 %vm132_vm0, %v1684_v6 }
  0x1a   :  { %1346 = vmatmul.mubr.msk.bf16.gmra.mrb[4].mxu0 %vm132_vm0, %v1685_v7 }
  0x1b   :  { %1349 = vmatprep.mubr.msk.bf16.mxu0 %vm132_vm0, %v1686_v8 }
  0x22   :  { %1350 = vmatmul.mubr.msk.bf16.gmra.mrb[8].mxu0 %vm132_vm0, %v1687_v9 }
  0x23   :  { %1353 = vmatprep.mubr.msk.bf16.mxu0 %vm132_vm0, %v1688_v10 }
  0x2a   :  { %1354 = vmatmul.mubr.msk.bf16.gmra.mrb[12].mxu0 %vm132_vm0, %v1689_v11 }
  0x2b   :  { %1444 = vmatprep.mubr.msk.f32.mxu0 %vm1702_vm1, %v1703_v52 }
  0xe5   :  { %v1774_v13 = vpop.f32.mrb[0].mxu0 }
  0xe6   :  { %v1776_v14 = vpop.f32.mrb[1].mxu0  ;;  %v256_v16 = vmul.f32 %v1774_v13, %v1774_v13 }
  0xe7   :  { %v1778_v15 = vpop.f32.mrb[2].mxu0  ;;  %v254_v19 = vmul.f32 %v1776_v14, %v1776_v14 }
  0xe8   :  { %v257_v17 = vmul.f32 %v1778_v15, %v1778_v15  ;;  %v1784_v18 = vpop.f32.mrb[3].mxu0 }
  0xe9   :  { %v255_v20 = vmul.f32 %v1784_v18, %v1784_v18 }
  0xea   :  { %v1603_v21 = vpack.i.bf16 %v257_v17, %v256_v16 }
  0xeb   :  { %v1598_v22 = vpack.i.bf16 %v255_v20, %v254_v19 }
  0xed   :  { %1599 = vrot.lane.b32.xlu0 %v1598_v22, %s1701_s0  ;;  %v1791_v23 = vpop.f32.mrb[4].mxu0 }
  0xee   :  { %v1793_v24 = vpop.f32.mrb[5].mxu0  ;;  %v260_v26 = vmul.f32 %v1791_v23, %v1791_v23 }
  0xef   :  { %v1795_v25 = vpop.f32.mrb[6].mxu0  ;;  %v258_v29 = vmul.f32 %v1793_v24, %v1793_v24 }
  0xf0   :  { %v261_v27 = vmul.f32 %v1795_v25, %v1795_v25  ;;  %v1801_v28 = vpop.f32.mrb[7].mxu0 }
  0xf1   :  { %1604 = vrot.lane.b32.xlu0 %v1603_v21, %s1701_s0  ;;  %v259_v30 = vmul.f32 %v1801_v28, %v1801_v28 }
  0xf2   :  { %v1613_v31 = vpack.i.bf16 %v261_v27, %v260_v26 }
  0xf3   :  { %v1608_v32 = vpack.i.bf16 %v259_v30, %v258_v29 }
  0xf5   :  { %1609 = vrot.lane.b32.xlu1 %v1608_v32, %s1701_s0  ;;  %v1809_v33 = vpop.f32.mrb[8].mxu0 }
  0xf6   :  { %v1811_v34 = vpop.f32.mrb[9].mxu0  ;;  %v264_v36 = vmul.f32 %v1809_v33, %v1809_v33 }
  0xf7   :  { %v1813_v35 = vpop.f32.mrb[10].mxu0  ;;  %v262_v39 = vmul.f32 %v1811_v34, %v1811_v34 }
  0xf8   :  { %v265_v37 = vmul.f32 %v1813_v35, %v1813_v35  ;;  %v1819_v38 = vpop.f32.mrb[11].mxu0 }
  0xf9   :  { %v263_v40 = vmul.f32 %v1819_v38, %v1819_v38  ;;  %1614 = vrot.lane.b32.xlu1 %v1613_v31, %s1701_s0 }
  0xfa   :  { %v1623_v41 = vpack.i.bf16 %v265_v37, %v264_v36 }
  0xfb   :  { %v1618_v42 = vpack.i.bf16 %v263_v40, %v262_v39  ;;  %v36_v39 = vlaneseq }
  0xfd   :  { %1624 = vrot.lane.b32.xlu1 %v1623_v41, %s1701_s0  ;;  %1619 = vrot.lane.b32.xlu0 %v1618_v42, %s1701_s0  ;;  %v1828_v43 = vpop.f32.mrb[12].mxu0 }
  0xfe   :  { %v1830_v44 = vpop.f32.mrb[13].mxu0  ;;  %v268_v46 = vmul.f32 %v1828_v43, %v1828_v43 }
  0xff   :  { %v1832_v45 = vpop.f32.mrb[14].mxu0  ;;  %v266_v49 = vmul.f32 %v1830_v44, %v1830_v44 }
 0x100   :  { %v269_v47 = vmul.f32 %v1832_v45, %v1832_v45  ;;  %v1838_v48 = vpop.f32.mrb[15].mxu0 }
 0x101   :  { %v267_v50 = vmul.f32 %v1838_v48, %v1838_v48 }
 0x102   :  { %v1633_v51 = vpack.i.bf16 %v269_v47, %v268_v46 }
 0x103   :  { %v1628_v53 = vpack.i.bf16 %v267_v50, %v266_v49 }
 0x104   :  { %1634 = vrot.lane.b32.xlu1 %v1633_v51, %s1701_s0 }
 0x105   :  { %1629 = vrot.lane.b32.xlu0 %v1628_v53, %s1701_s0  ;;  %v1883_v53 = vand.u32 127, %v36_v39 }
 0x15f   :  { %v1600_v54 = vpop.permute.xlu0 %1599 }
 0x160   :  { %v1602_v55 = vunpack.i.h.bf16 %v1600_v54  ;;  %v1601_v56 = vunpack.i.l.bf16 %v1600_v54 }
 0x162   :  { %v335_v57 = vsel %vm334_vm2, %v1776_v14, %v1601_v56  ;;  %v336_v58 = vsel %vm334_vm2, %v1784_v18, %v1602_v55 }
 0x163   :  { %v1605_v59 = vpop.permute.xlu0 %1604  ;;  %v1515_v60 = vpack.c.bf16 %v336_v58, %v335_v57  ;;  %v42_v58 = vand.u32 31, %v1883_v53 }
 0x164   :  { %v1607_v61 = vunpack.i.h.bf16 %v1605_v59  ;;  %v1606_v62 = vunpack.i.l.bf16 %v1605_v59 }
 0x165   :  { %1516 = vmatpush3.bf16.msra.mxu1 %v1515_v60  ;;  %vm1892_vm3 = vcmp.lt.s32.totalorder %v42_v58, 25  ;;  %v1704_v60 = vmov 0.01  }
 0x166   :  { %1517 = vmatprep.subr.bf16.mxu1 %v1700_v12  ;;  %v337_v63 = vsel %vm334_vm2, %v1774_v13, %v1606_v62  ;;  %v338_v0 = vsel %vm334_vm2, %v1778_v15, %v1607_v61  ;;  %v31_v61 = vld [vmem:[%s2143_s2 + $0x20] sm:$0x1] }
 0x167   :  { %v1610_v1 = vpop.permute.xlu1 %1609  ;;  %v1518_v2 = vpack.c.bf16 %v338_v0, %v337_v63  ;;  %430 = vrot.lane.b32.xlu1 %v31_v61, %s1701_s0 }
 0x168   :  { %v1612_v3 = vunpack.i.h.bf16 %v1610_v1  ;;  %v1611_v4 = vunpack.i.l.bf16 %v1610_v1 }
 0x169   :  { %1519 = vmatpush3.bf16.msra.mxu1 %v1518_v2 }
 0x16a   :  { %1520 = vmatprep.subr.bf16.mxu1 %v1700_v12  ;;  %v339_v5 = vsel %vm334_vm2, %v1793_v24, %v1611_v4  ;;  %v340_v6 = vsel %vm334_vm2, %v1801_v28, %v1612_v3  ;;  %v1690_v4 = vld [vmem:[%s2141_s1 + $0x20] sm:$0xff]  }
 0x16b   :  { %v1615_v7 = vpop.permute.xlu1 %1614  ;;  %v1521_v8 = vpack.c.bf16 %v340_v6, %v339_v5  ;;  %v1691_v5 = vld [vmem:[%s2141_s1 + $0x28] sm:$0xff]   ;;  %v1910_v6 = vshrl.u32 %v36_v39, 7 }
 0x16c   :  { %v1617_v9 = vunpack.i.h.bf16 %v1615_v7  ;;  %v1616_v10 = vunpack.i.l.bf16 %v1615_v7 }
 0x16d   :  { %1522 = vmatpush3.bf16.msra.mxu1 %v1521_v8  ;;  %v1913_v8 = vsub.s32 0, %v1910_v6 }
 0x16e   :  { %1523 = vmatprep.subr.bf16.mxu1 %v1700_v12  ;;  %v341_v11 = vsel %vm334_vm2, %v1791_v23, %v1616_v10  ;;  %v342_v16 = vsel %vm334_vm2, %v1795_v25, %v1617_v9 }
 0x16f   :  { %v1625_v17 = vpop.permute.xlu1 %1624  ;;  %v1620_v19 = vpop.permute.xlu0 %1619  ;;  %v1524_v20 = vpack.c.bf16 %v342_v16, %v341_v11  ;;  %v32_v16 = vld [vmem:[%s2143_s2 + $0x21] sm:$0x1] }
 0x170   :  { %v1627_v21 = vunpack.i.h.bf16 %v1625_v17  ;;  %v1626_v22 = vunpack.i.l.bf16 %v1625_v17  ;;  %v1622_v26 = vunpack.i.h.bf16 %v1620_v19  ;;  %v1621_v27 = vunpack.i.l.bf16 %v1620_v19 }
 0x171   :  { %1525 = vmatpush3.bf16.msra.mxu1 %v1524_v20 }
 0x172   :  { %1526 = vmatprep.subr.bf16.mxu1 %v1700_v12  ;;  %v343_v29 = vsel %vm334_vm2, %v1811_v34, %v1621_v27  ;;  %v344_v30 = vsel %vm334_vm2, %v1819_v38, %v1622_v26  ;;  %v345_v31 = vsel %vm334_vm2, %v1809_v33, %v1626_v22  ;;  %v346_v32 = vsel %vm334_vm2, %v1813_v35, %v1627_v21 }
 0x173   :  { %v1527_v36 = vpack.c.bf16 %v344_v30, %v343_v29  ;;  %v1530_v37 = vpack.c.bf16 %v346_v32, %v345_v31 }
 0x175   :  { %1528 = vmatpush3.bf16.msra.mxu1 %v1527_v36 }
 0x176   :  { %v1635_v40 = vpop.permute.xlu1 %1634  ;;  %1529 = vmatprep.subr.bf16.mxu1 %v1700_v12 }
 0x177   :  { %v1637_v41 = vunpack.i.h.bf16 %v1635_v40  ;;  %v1636_v42 = vunpack.i.l.bf16 %v1635_v40  ;;  %v1630_v46 = vpop.permute.xlu0 %1629 }
 0x178   :  { %v1632_v47 = vunpack.i.h.bf16 %v1630_v46  ;;  %v1631_v49 = vunpack.i.l.bf16 %v1630_v46 }
 0x179   :  { %1531 = vmatpush3.bf16.msra.mxu1 %v1530_v37  ;;  %v349_v50 = vsel %vm334_vm2, %v1828_v43, %v1636_v42  ;;  %v350_v51 = vsel %vm334_vm2, %v1832_v45, %v1637_v41 }
 0x17a   :  { %1532 = vmatprep.subr.bf16.mxu1 %v1700_v12  ;;  %v347_v54 = vsel %vm334_vm2, %v1830_v44, %v1631_v49  ;;  %v348_v55 = vsel %vm334_vm2, %v1838_v48, %v1632_v47  ;;  %v1536_v56 = vpack.c.bf16 %v350_v51, %v349_v50 }
 0x17b   :  { %v1533_v57 = vpack.c.bf16 %v348_v55, %v347_v54 }
 0x17d   :  { %1534 = vmatpush3.bf16.msra.mxu1 %v1533_v57 }
 0x17e   :  { %1535 = vmatprep.subr.bf16.mxu1 %v1700_v12 }
 0x181   :  { %1537 = vmatpush3.bf16.msra.mxu1 %v1536_v56 }
 0x182   :  { %1392 = vmatprep.subr.bf16.mxu1 %v1690_v4 }
 0x184   :  { %1390 = vmatmul.mubr.msk.f32.vlgmr.msra.gmra.mrb[0].mxu1 %vm1892_vm3, %v1704_v60 }
 0x185   :  { %1393 = vmatpush3.bf16.msra.mxu1 %v1690_v4 }
 0x186   :  { %1394 = vmatprep.subr.bf16.mxu1 %v1691_v5 }
 0x189   :  { %1395 = vmatpush3.bf16.msra.mxu1 %v1691_v5 }
 0x18a   :  { %1566 = vmatprep.subr.bf16.mxu1 %v1700_v12 }
 0x1d9   :  { %v431_v7 = vpop.permute.xlu1 %430 }
 0x257   :  { %v417_v62 = vpop.f32.mrb[0].mxu1 }
 0x258   :  { %v421_v63 = vmul.f32 %v417_v62, %v417_v62  ;;  %v1391_v0 = vpop.f32.mrb[1].mxu1 }
 0x25a   :  { %423 = vrot.lane.b32.xlu0 %v421_v63, %s1701_s0 }
 0x2cc   :  { %v424_v1 = vpop.permute.xlu0 %423 }
 0x2cd   :  { %v426_v2 = vsub.f32 %v417_v62, %v424_v1 }
 0x2cf   :  { %v427_v3 = vadd.f32 1e-05, %v426_v2 }
 0x2d1   :  { %1692 = vrsqrt.f32 %v427_v3 }
 0x2db   :  { %v1693_v9 = vpop.eup %1692 }
 0x2dc   :  { %v433_v10 = vmul.f32 %v1693_v9, %v431_v7 }
 0x2de   :  { %v443_v11 = vrot.slane %v433_v10, %v1913_v8  ;;  %435 = vrot.lane.b32.xlu0 %v433_v10, %s1705_s15 }
 0x2e0   :  { %445 = vrot.lane.b32.xlu1 %v443_v11, %s1705_s15 }
 0x350   :  { %v436_v17 = vpop.permute.xlu0 %435 }
 0x351   :  { %v438_v19 = vmul.f32 %v436_v17, %v417_v62 }
 0x352   :  { %v446_v20 = vpop.permute.xlu1 %445 }
 0x353   :  { %v439_v21 = vsub.f32 %v32_v16, %v438_v19  ;;  %v448_v22 = vmul.f32 %v446_v20, %v1776_v14  ;;  %v449_v26 = vmul.f32 %v446_v20, %v1784_v18  ;;  %v450_v27 = vmul.f32 %v1774_v13, %v446_v20 }
 0x354   :  { %v451_v29 = vmul.f32 %v1778_v15, %v446_v20  ;;  %v452_v30 = vmul.f32 %v446_v20, %v1793_v24  ;;  %v453_v31 = vmul.f32 %v446_v20, %v1801_v28  ;;  %v454_v32 = vmul.f32 %v1791_v23, %v446_v20 }
 0x355   :  { %v467_v36 = vrot.slane %v439_v21, %v1913_v8  ;;  %v455_v37 = vmul.f32 %v1795_v25, %v446_v20  ;;  %v456_v39 = vmul.f32 %v446_v20, %v1811_v34  ;;  %v457_v14 = vmul.f32 %v446_v20, %v1819_v38 }
 0x356   :  { %v458_v18 = vmul.f32 %v1809_v33, %v446_v20  ;;  %v459_v13 = vmul.f32 %v1813_v35, %v446_v20  ;;  %v460_v15 = vmul.f32 %v446_v20, %v1830_v44  ;;  %v461_v24 = vmul.f32 %v446_v20, %v1838_v48 }
 0x357   :  { %v468_v40 = vadd.f32 %v467_v36, %v448_v22  ;;  %v469_v28 = vadd.f32 %v467_v36, %v449_v26  ;;  %v470_v41 = vadd.f32 %v467_v36, %v450_v27  ;;  %v471_v23 = vadd.f32 %v467_v36, %v451_v29 }
 0x358   :  { %v472_v42 = vadd.f32 %v467_v36, %v452_v30  ;;  %v473_v46 = vadd.f32 %v467_v36, %v453_v31  ;;  %v474_v47 = vadd.f32 %v467_v36, %v454_v32  ;;  %v475_v25 = vadd.f32 %v467_v36, %v455_v37 }
 0x359   :  { %v484_v49 = vmax.f32 %v468_v40, 0.0  ;;  %v485_v34 = vmax.f32 %v469_v28, 0.0  ;;  %v486_v50 = vmax.f32 %v470_v41, 0.0  ;;  %v487_v38 = vmax.f32 %v471_v23, 0.0 }
 0x35a   :  { %v488_v51 = vmax.f32 %v472_v42, 0.0  ;;  %v489_v33 = vmax.f32 %v473_v46, 0.0  ;;  %v490_v54 = vmax.f32 %v474_v47, 0.0  ;;  %v491_v35 = vmax.f32 %v475_v25, 0.0 }
 0x35b   :  { %v500_v55 = vpack.c.bf16 %v485_v34, %v484_v49  ;;  %v501_v44 = vpack.c.bf16 %v487_v38, %v486_v50  ;;  %v476_v56 = vadd.f32 %v467_v36, %v456_v39  ;;  %v477_v48 = vadd.f32 %v467_v36, %v457_v14 }
 0x35c   :  { %v502_v57 = vpack.c.bf16 %v489_v33, %v488_v51  ;;  %v503_v58 = vpack.c.bf16 %v491_v35, %v490_v54  ;;  %v478_v61 = vadd.f32 %v467_v36, %v458_v18  ;;  %v479_v62 = vadd.f32 %v467_v36, %v459_v13 }
 0x35d   :  { %1396 = vmatprep.mubr.msk.bf16.mxu1 %vm334_vm2, %v500_v55  ;;  %v492_v63 = vmax.f32 %v476_v56, 0.0  ;;  %v493_v0 = vmax.f32 %v477_v48, 0.0  ;;  %v480_v1 = vadd.f32 %v467_v36, %v460_v15  ;;  %v481_v2 = vadd.f32 %v467_v36, %v461_v24 }
 0x35e   :  { %1397 = vmatmul.mubr.msk.bf16.vlgmr.msra.gmra.mrb[4].mxu1 %vm334_vm2, %v501_v44  ;;  %v494_v3 = vmax.f32 %v478_v61, 0.0  ;;  %v495_v4 = vmax.f32 %v479_v62, 0.0  ;;  %v462_v5 = vmul.f32 %v1828_v43, %v446_v20  ;;  %v463_v7 = vmul.f32 %v1832_v45, %v446_v20 }
 0x35f   :  { %1400 = vmatprep.mubr.msk.bf16.mxu1 %vm334_vm2, %v502_v57  ;;  %v504_v9 = vpack.c.bf16 %v493_v0, %v492_v63  ;;  %v496_v10 = vmax.f32 %v480_v1, 0.0  ;;  %v497_v11 = vmax.f32 %v481_v2, 0.0 }
 0x360   :  { %v505_v16 = vpack.c.bf16 %v495_v4, %v494_v3  ;;  %v482_v17 = vadd.f32 %v467_v36, %v462_v5  ;;  %v483_v19 = vadd.f32 %v467_v36, %v463_v7 }
 0x361   :  { %v506_v21 = vpack.c.bf16 %v497_v11, %v496_v10 }
 0x362   :  { %v498_v22 = vmax.f32 %v482_v17, 0.0  ;;  %v499_v26 = vmax.f32 %v483_v19, 0.0 }
 0x364   :  { %v507_v27 = vpack.c.bf16 %v499_v26, %v498_v22 }
 0x366   :  { %1401 = vmatmul.mubr.msk.bf16.gmra.mrb[8].mxu1 %vm334_vm2, %v503_v58 }
 0x367   :  { %1404 = vmatprep.mubr.msk.bf16.mxu1 %vm334_vm2, %v504_v9 }
 0x36e   :  { %1405 = vmatmul.mubr.msk.bf16.gmra.mrb[12].mxu1 %vm334_vm2, %v505_v16 }
 0x36f   :  { %1408 = vmatprep.mubr.msk.bf16.mxu1 %vm334_vm2, %v506_v21 }
 0x376   :  { %1409 = vmatmul.mubr.msk.bf16.gmra.mrb[16].mxu1 %vm334_vm2, %v507_v27 }
 0x377   :  { %1511 = vmatprep.mubr.msk.f32.mxu1 %vm1702_vm1, %v1703_v52 }
 0x431   :  { %v1949_v43 = vpop.f32.mrb[4].mxu1 }
 0x432   :  { %v1951_v45 = vpop.f32.mrb[5].mxu1  ;;  %v643_v29 = vmul.f32 %v1949_v43, %v1949_v43 }
 0x433   :  { %v1953_v20 = vpop.f32.mrb[6].mxu1  ;;  %v641_v32 = vmul.f32 %v1951_v45, %v1951_v45 }
 0x434   :  { %v644_v30 = vmul.f32 %v1953_v20, %v1953_v20  ;;  %v1959_v31 = vpop.f32.mrb[7].mxu1 }
 0x435   :  { %v642_v52 = vmul.f32 %v1959_v31, %v1959_v31 }
 0x436   :  { %v1643_v36 = vpack.i.bf16 %v644_v30, %v643_v29 }
 0x437   :  { %v1638_v37 = vpack.i.bf16 %v642_v52, %v641_v32 }
 0x438   :  { %1644 = vrot.lane.b32.xlu1 %v1643_v36, %s1701_s0 }
 0x439   :  { %1639 = vrot.lane.b32.xlu0 %v1638_v37, %s1701_s0  ;;  %v1967_v39 = vpop.f32.mrb[8].mxu1 }
 0x43a   :  { %v1969_v14 = vpop.f32.mrb[9].mxu1  ;;  %v647_v13 = vmul.f32 %v1967_v39, %v1967_v39 }
 0x43b   :  { %v1971_v18 = vpop.f32.mrb[10].mxu1  ;;  %v645_v40 = vmul.f32 %v1969_v14, %v1969_v14 }
 0x43c   :  { %v648_v15 = vmul.f32 %v1971_v18, %v1971_v18  ;;  %v1977_v24 = vpop.f32.mrb[11].mxu1 }
 0x43d   :  { %v646_v28 = vmul.f32 %v1977_v24, %v1977_v24 }
 0x43e   :  { %v1653_v41 = vpack.i.bf16 %v648_v15, %v647_v13 }
 0x43f   :  { %v1648_v23 = vpack.i.bf16 %v646_v28, %v645_v40 }
 0x440   :  { %1654 = vrot.lane.b32.xlu1 %v1653_v41, %s1701_s0 }
 0x441   :  { %1649 = vrot.lane.b32.xlu0 %v1648_v23, %s1701_s0  ;;  %v1985_v42 = vpop.f32.mrb[12].mxu1 }
 0x442   :  { %v1987_v46 = vpop.f32.mrb[13].mxu1  ;;  %v651_v25 = vmul.f32 %v1985_v42, %v1985_v42 }
 0x443   :  { %v1989_v47 = vpop.f32.mrb[14].mxu1  ;;  %v649_v50 = vmul.f32 %v1987_v46, %v1987_v46 }
 0x444   :  { %v652_v49 = vmul.f32 %v1989_v47, %v1989_v47  ;;  %v1995_v34 = vpop.f32.mrb[15].mxu1 }
 0x445   :  { %v650_v38 = vmul.f32 %v1995_v34, %v1995_v34 }
 0x446   :  { %v1663_v51 = vpack.i.bf16 %v652_v49, %v651_v25 }
 0x447   :  { %v1658_v33 = vpack.i.bf16 %v650_v38, %v649_v50 }
 0x448   :  { %1664 = vrot.lane.b32.xlu1 %v1663_v51, %s1701_s0 }
 0x449   :  { %1659 = vrot.lane.b32.xlu0 %v1658_v33, %s1701_s0  ;;  %v2003_v54 = vpop.f32.mrb[16].mxu1 }
 0x44a   :  { %v2005_v35 = vpop.f32.mrb[17].mxu1  ;;  %v655_v44 = vmul.f32 %v2003_v54, %v2003_v54 }
 0x44b   :  { %v2007_v55 = vpop.f32.mrb[18].mxu1  ;;  %v653_v57 = vmul.f32 %v2005_v35, %v2005_v35 }
 0x44c   :  { %v656_v56 = vmul.f32 %v2007_v55, %v2007_v55  ;;  %v2013_v48 = vpop.f32.mrb[19].mxu1 }
 0x44d   :  { %v654_v58 = vmul.f32 %v2013_v48, %v2013_v48 }
 0x44e   :  { %v1673_v61 = vpack.i.bf16 %v656_v56, %v655_v44 }
 0x44f   :  { %v1668_v62 = vpack.i.bf16 %v654_v58, %v653_v57 }
 0x450   :  { %1674 = vrot.lane.b32.xlu1 %v1673_v61, %s1701_s0 }
 0x451   :  { %1669 = vrot.lane.b32.xlu0 %v1668_v62, %s1701_s0 }
 0x4aa   :  { %v1645_v63 = vpop.permute.xlu1 %1644 }
 0x4ab   :  { %v1647_v0 = vunpack.i.h.bf16 %v1645_v63  ;;  %v1646_v1 = vunpack.i.l.bf16 %v1645_v63  ;;  %v1640_v2 = vpop.permute.xlu0 %1639 }
 0x4ac   :  { %v1642_v3 = vunpack.i.h.bf16 %v1640_v2  ;;  %v1641_v4 = vunpack.i.l.bf16 %v1640_v2 }
 0x4ad   :  { %v724_v5 = vsel %vm334_vm2, %v1953_v20, %v1647_v0  ;;  %v723_v7 = vsel %vm334_vm2, %v1949_v43, %v1646_v1 }
 0x4ae   :  { %v1542_v9 = vpack.c.bf16 %v724_v5, %v723_v7  ;;  %v722_v10 = vsel %vm334_vm2, %v1959_v31, %v1642_v3  ;;  %v721_v11 = vsel %vm334_vm2, %v1951_v45, %v1641_v4  ;;  %v33_v5 = vld [vmem:[%s2143_s2 + $0x22] sm:$0x1] }
 0x4af   :  { %v1539_v16 = vpack.c.bf16 %v722_v10, %v721_v11  ;;  %816 = vrot.lane.b32.xlu1 %v33_v5, %s1701_s0 }
 0x4b1   :  { %1540 = vmatpush3.bf16.msra.mxu0 %v1539_v16 }
 0x4b2   :  { %v1655_v17 = vpop.permute.xlu1 %1654  ;;  %1541 = vmatprep.subr.bf16.mxu0 %v1700_v12 }
 0x4b3   :  { %v1657_v19 = vunpack.i.h.bf16 %v1655_v17  ;;  %v1656_v21 = vunpack.i.l.bf16 %v1655_v17  ;;  %v1650_v22 = vpop.permute.xlu0 %1649 }
 0x4b4   :  { %v1652_v26 = vunpack.i.h.bf16 %v1650_v22  ;;  %v1651_v27 = vunpack.i.l.bf16 %v1650_v22 }
 0x4b5   :  { %v728_v29 = vsel %vm334_vm2, %v1971_v18, %v1657_v19  ;;  %v727_v30 = vsel %vm334_vm2, %v1967_v39, %v1656_v21  ;;  %1543 = vmatpush3.bf16.msra.mxu0 %v1542_v9  ;;  %v1706_v19 = vmov 1.0|1.0  }
 0x4b6   :  { %v1548_v32 = vpack.c.bf16 %v728_v29, %v727_v30  ;;  %v726_v52 = vsel %vm334_vm2, %v1977_v24, %v1652_v26  ;;  %v725_v36 = vsel %vm334_vm2, %v1969_v14, %v1651_v27  ;;  %1544 = vmatprep.subr.bf16.mxu0 %v1700_v12  ;;  %v34_v26 = vld [vmem:[%s2143_s2 + $0x23] sm:$0x1] }
 0x4b7   :  { %v1545_v37 = vpack.c.bf16 %v726_v52, %v725_v36 }
 0x4b9   :  { %1546 = vmatpush3.bf16.msra.mxu0 %v1545_v37 }
 0x4ba   :  { %v1665_v13 = vpop.permute.xlu1 %1664  ;;  %1547 = vmatprep.subr.bf16.mxu0 %v1700_v12 }
 0x4bb   :  { %v1667_v15 = vunpack.i.h.bf16 %v1665_v13  ;;  %v1666_v40 = vunpack.i.l.bf16 %v1665_v13  ;;  %v1660_v28 = vpop.permute.xlu0 %1659 }
 0x4bc   :  { %v1662_v41 = vunpack.i.h.bf16 %v1660_v28  ;;  %v1661_v23 = vunpack.i.l.bf16 %v1660_v28 }
 0x4bd   :  { %v732_v25 = vsel %vm334_vm2, %v1989_v47, %v1667_v15  ;;  %v731_v49 = vsel %vm334_vm2, %v1985_v42, %v1666_v40  ;;  %1549 = vmatpush3.bf16.msra.mxu0 %v1548_v32 }
 0x4be   :  { %v1554_v50 = vpack.c.bf16 %v732_v25, %v731_v49  ;;  %v730_v38 = vsel %vm334_vm2, %v1995_v34, %v1662_v41  ;;  %v729_v51 = vsel %vm334_vm2, %v1987_v46, %v1661_v23  ;;  %1550 = vmatprep.subr.bf16.mxu0 %v1700_v12 }
 0x4bf   :  { %v1551_v33 = vpack.c.bf16 %v730_v38, %v729_v51 }
 0x4c1   :  { %1552 = vmatpush3.bf16.msra.mxu0 %v1551_v33 }
 0x4c2   :  { %v1675_v44 = vpop.permute.xlu1 %1674  ;;  %1553 = vmatprep.subr.bf16.mxu0 %v1700_v12 }
 0x4c3   :  { %v1677_v56 = vunpack.i.h.bf16 %v1675_v44  ;;  %v1676_v57 = vunpack.i.l.bf16 %v1675_v44  ;;  %v1670_v58 = vpop.permute.xlu0 %1669 }
 0x4c4   :  { %v1672_v61 = vunpack.i.h.bf16 %v1670_v58  ;;  %v1671_v62 = vunpack.i.l.bf16 %v1670_v58 }
 0x4c5   :  { %v736_v63 = vsel %vm334_vm2, %v2007_v55, %v1677_v56  ;;  %v735_v0 = vsel %vm334_vm2, %v2003_v54, %v1676_v57  ;;  %1555 = vmatpush3.bf16.msra.mxu0 %v1554_v50 }
 0x4c6   :  { %v1560_v1 = vpack.c.bf16 %v736_v63, %v735_v0  ;;  %v734_v2 = vsel %vm334_vm2, %v2013_v48, %v1672_v61  ;;  %v733_v3 = vsel %vm334_vm2, %v2005_v35, %v1671_v62  ;;  %1556 = vmatprep.subr.bf16.mxu0 %v1700_v12 }
 0x4c7   :  { %v1557_v4 = vpack.c.bf16 %v734_v2, %v733_v3 }
 0x4c9   :  { %1558 = vmatpush3.bf16.msra.mxu0 %v1557_v4 }
 0x4ca   :  { %1559 = vmatprep.subr.bf16.mxu0 %v1700_v12 }
 0x4cd   :  { %1561 = vmatpush3.bf16.msra.mxu0 %v1560_v1 }
 0x4ce   :  { %1562 = vmatprep.subr.bf16.mxu0 %v1706_v19 }
 0x4d0   :  { %1445 = vmatmul.mubr.msk.f32.vlgmr.msra.gmra.mrb[16].mxu0 %vm1892_vm3, %v1704_v60 }
 0x4d1   :  { %1563 = vmatpush3.bf16.msra.mxu0 %v1706_v19 }
 0x4d2   :  { %1564 = vmatprep.subr.bf16.mxu0 %v1706_v19 }
 0x4d5   :  { %1565 = vmatpush3.bf16.msra.mxu0 %v1706_v19 }
 0x521   :  { %v817_v59 = vpop.permute.xlu1 %816 }
 0x5a3   :  { %v803_v7 = vpop.f32.mrb[16].mxu0 }
 0x5a4   :  { %v807_v9 = vmul.f32 %v803_v7, %v803_v7  ;;  %v1446_v10 = vpop.f32.mrb[17].mxu0 }
 0x5a6   :  { %809 = vrot.lane.b32.xlu0 %v807_v9, %s1701_s0 }
 0x618   :  { %v810_v11 = vpop.permute.xlu0 %809 }
 0x619   :  { %v812_v16 = vsub.f32 %v803_v7, %v810_v11 }
 0x61b   :  { %v813_v17 = vadd.f32 1e-05, %v812_v16 }
 0x61d   :  { %1694 = vrsqrt.f32 %v813_v17 }
 0x627   :  { %v1695_v60 = vpop.eup %1694 }
 0x628   :  { %v819_v21 = vmul.f32 %v1695_v60, %v817_v59 }
 0x62a   :  { %v829_v22 = vrot.slane %v819_v21, %v1913_v8  ;;  %821 = vrot.lane.b32.xlu0 %v819_v21, %s1705_s15 }
 0x62c   :  { %831 = vrot.lane.b32.xlu1 %v829_v22, %s1705_s15 }
 0x69c   :  { %v822_v27 = vpop.permute.xlu0 %821 }
 0x69d   :  { %v824_v29 = vmul.f32 %v822_v27, %v803_v7 }
 0x69e   :  { %v832_v30 = vpop.permute.xlu1 %831 }
 0x69f   :  { %v825_v32 = vsub.f32 %v34_v26, %v824_v29  ;;  %v834_v52 = vmul.f32 %v832_v30, %v1951_v45  ;;  %v835_v37 = vmul.f32 %v832_v30, %v1959_v31  ;;  %v836_v13 = vmul.f32 %v1949_v43, %v832_v30  ;;  %v2089_v43 = vld [vmem:[%s2143_s2 + $0x8] sm:$0xff] }
 0x6a0   :  { %v837_v15 = vmul.f32 %v1953_v20, %v832_v30  ;;  %v838_v40 = vmul.f32 %v832_v30, %v1969_v14  ;;  %v839_v28 = vmul.f32 %v832_v30, %v1977_v24  ;;  %v840_v41 = vmul.f32 %v1967_v39, %v832_v30 }
 0x6a1   :  { %v853_v36 = vrot.slane %v825_v32, %v1913_v8  ;;  %v841_v23 = vmul.f32 %v1971_v18, %v832_v30  ;;  %v27_v8 = vld [vmem:[%s2143_s2] sm:$0xff]  ;;  %v29_v18 = vld [vmem:[%s2143_s2 + $0x10] sm:$0xff]  ;;  %v842_v33 = vmul.f32 %v832_v30, %v1987_v46  ;;  %v843_v44 = vmul.f32 %v832_v30, %v1995_v34  ;;  %v30_v46 = vld [vmem:[%s2143_s2 + $0x18] sm:$0xff] }
 0x6a2   :  { %v844_v56 = vmul.f32 %v1985_v42, %v832_v30  ;;  %v845_v61 = vmul.f32 %v1989_v47, %v832_v30  ;;  %v846_v62 = vmul.f32 %v832_v30, %v2005_v35  ;;  %v847_v2 = vmul.f32 %v832_v30, %v2013_v48 }
 0x6a3   :  { %v854_v25 = vadd.f32 %v853_v36, %v834_v52  ;;  %v855_v49 = vadd.f32 %v853_v36, %v835_v37  ;;  %v856_v50 = vadd.f32 %v853_v36, %v836_v13  ;;  %v857_v45 = vadd.f32 %v853_v36, %v837_v15 }
 0x6a4   :  { %v858_v20 = vadd.f32 %v853_v36, %v838_v40  ;;  %v859_v31 = vadd.f32 %v853_v36, %v839_v28  ;;  %v860_v14 = vadd.f32 %v853_v36, %v840_v41  ;;  %v861_v24 = vadd.f32 %v853_v36, %v841_v23 }
 0x6a5   :  { %v870_v39 = vmax.f32 %v854_v25, 0.0  ;;  %v871_v38 = vmax.f32 %v855_v49, 0.0  ;;  %v872_v51 = vmax.f32 %v856_v50, 0.0  ;;  %v873_v0 = vmax.f32 %v857_v45, 0.0 }
 0x6a6   :  { %v874_v1 = vmax.f32 %v858_v20, 0.0  ;;  %v862_v34 = vadd.f32 %v853_v36, %v842_v33  ;;  %v863_v42 = vadd.f32 %v853_v36, %v843_v44  ;;  %v864_v3 = vadd.f32 %v853_v36, %v844_v56 }
 0x6a7   :  { %v886_v57 = vmul.f32 %v870_v39, %v27_v8  ;;  %v887_v58 = vmul.f32 %v871_v38, %v2089_v43  ;;  %v888_v63 = vmul.f32 %v872_v51, %v29_v18  ;;  %v865_v4 = vadd.f32 %v853_v36, %v845_v61 }
 0x6a8   :  { %v866_v47 = vadd.f32 %v853_v36, %v846_v62  ;;  %v867_v5 = vadd.f32 %v853_v36, %v847_v2  ;;  %v848_v35 = vmul.f32 %v2003_v54, %v832_v30  ;;  %v849_v7 = vmul.f32 %v2007_v55, %v832_v30 }
 0x6a9   :  { %1455 = vmatprep.mubr.msk.f32.mxu0 %vm334_vm2, %v886_v57  ;;  %v889_v48 = vmul.f32 %v873_v0, %v30_v46  ;;  %v875_v9 = vmax.f32 %v859_v31, 0.0  ;;  %v890_v16 = vmul.f32 %v874_v1, %v27_v8  ;;  %v876_v17 = vmax.f32 %v860_v14, 0.0 }
 0x6aa   :  { %1456 = vmatmul.mubr.msk.f32.vlgmr.msra.gmra.mrb[18].mxu0 %vm334_vm2, %v887_v58  ;;  %v868_v10 = vadd.f32 %v853_v36, %v848_v35  ;;  %v869_v11 = vadd.f32 %v853_v36, %v849_v7  ;;  %v877_v59 = vmax.f32 %v861_v24, 0.0  ;;  %v878_v21 = vmax.f32 %v862_v34, 0.0 }
 0x6ab   :  { %1458 = vmatprep.mubr.msk.f32.mxu0 %vm334_vm2, %v888_v63  ;;  %v891_v19 = vmul.f32 %v875_v9, %v2089_v43  ;;  %v892_v60 = vmul.f32 %v876_v17, %v29_v18  ;;  %v879_v55 = vmax.f32 %v863_v42, 0.0  ;;  %v880_v26 = vmax.f32 %v864_v3, 0.0 }
 0x6ac   :  { %v893_v54 = vmul.f32 %v877_v59, %v30_v46  ;;  %v894_v22 = vmul.f32 %v878_v21, %v27_v8  ;;  %v881_v29 = vmax.f32 %v865_v4, 0.0  ;;  %v882_v32 = vmax.f32 %v866_v47, 0.0 }
 0x6ad   :  { %v895_v27 = vmul.f32 %v879_v55, %v2089_v43  ;;  %v896_v30 = vmul.f32 %v880_v26, %v29_v18  ;;  %v883_v36 = vmax.f32 %v867_v5, 0.0  ;;  %v884_v13 = vmax.f32 %v868_v10, 0.0 }
 0x6ae   :  { %1459 = vmatmul.mubr.msk.f32.gmra.mrb[20].mxu0 %vm334_vm2, %v889_v48  ;;  %v897_v52 = vmul.f32 %v881_v29, %v30_v46  ;;  %v898_v37 = vmul.f32 %v882_v32, %v27_v8  ;;  %v885_v40 = vmax.f32 %v869_v11, 0.0  ;;  %v1097_v56 = vmul.u32 32, %v1910_v6 }
 0x6af   :  { %1461 = vmatprep.mubr.msk.f32.mxu0 %vm334_vm2, %v890_v16  ;;  %v899_v15 = vmul.f32 %v883_v36, %v2089_v43  ;;  %v900_v28 = vmul.f32 %v884_v13, %v29_v18  ;;  %v1707_v6 = vmov 1.0  }
 0x6b0   :  { %v901_v41 = vmul.f32 %v885_v40, %v30_v46  ;;  %v1099_v62 = vadd.s32 25, %v1097_v56  ;;  %vm1098_vm4 = vcmp.ge.s32.totalorder %v1883_v53, %v1097_v56  ;;  %v1237_v46 = vld [vmem:[%s2143_s2 + $0x24] ss:$0 sm:$0xff] }
 0x6b2   :  { %1462 = vmatmul.mubr.msk.f32.gmra.mrb[22].mxu0 %vm334_vm2, %v891_v19  ;;  %vm1100_vm5 = vcmp.lt.s32.totalorder %v1883_v53, %v1099_v62 }
 0x6b3   :  { %1464 = vmatprep.mubr.msk.f32.mxu0 %vm334_vm2, %v892_v60  ;;  %vm1101_vm6 = vmand %vm1098_vm4, %vm1100_vm5 }
 0x6b6   :  { %1465 = vmatmul.mubr.msk.f32.gmra.mrb[24].mxu0 %vm334_vm2, %v893_v54 }
 0x6b7   :  { %1467 = vmatprep.mubr.msk.f32.mxu0 %vm334_vm2, %v894_v22 }
 0x6ba   :  { %1468 = vmatmul.mubr.msk.f32.gmra.mrb[26].mxu0 %vm334_vm2, %v895_v27 }
 0x6bb   :  { %1470 = vmatprep.mubr.msk.f32.mxu0 %vm334_vm2, %v896_v30 }
 0x6be   :  { %1471 = vmatmul.mubr.msk.f32.gmra.mrb[28].mxu0 %vm334_vm2, %v897_v52 }
 0x6bf   :  { %1473 = vmatprep.mubr.msk.f32.mxu0 %vm334_vm2, %v898_v37 }
 0x6c2   :  { %1474 = vmatmul.mubr.msk.f32.gmra.mrb[30].mxu0 %vm334_vm2, %v899_v15 }
 0x6c3   :  { %1476 = vmatprep.mubr.msk.f32.mxu0 %vm334_vm2, %v900_v28 }
 0x6c6   :  { %1477 = vmatmul.mubr.msk.f32.gmra.mrb[32].mxu0 %vm334_vm2, %v901_v41 }
 0x77d   :  { %v1457_v23 = vpop.f32.mrb[18].mxu0 }
 0x77e   :  { %v1016_v25 = vpop.f32.mrb[19].mxu0 }
 0x77f   :  { %v1567_v49 = vpack.c.bf16 %v1457_v23, %v1016_v25 }
 0x781   :  { %v1460_v50 = vpop.f32.mrb[20].mxu0  ;;  %1568 = vmatpush3.bf16.msra.mxu1 %v1567_v49 }
 0x782   :  { %v1026_v45 = vpop.f32.mrb[21].mxu0  ;;  %1569 = vmatprep.subr.bf16.mxu1 %v1700_v12 }
 0x783   :  { %v1570_v8 = vpack.c.bf16 %v1460_v50, %v1026_v45 }
 0x785   :  { %v1463_v20 = vpop.f32.mrb[22].mxu0  ;;  %1571 = vmatpush3.bf16.msra.mxu1 %v1570_v8 }
 0x786   :  { %v1036_v43 = vpop.f32.mrb[23].mxu0  ;;  %1572 = vmatprep.subr.bf16.mxu1 %v1700_v12 }
 0x787   :  { %v1573_v31 = vpack.c.bf16 %v1463_v20, %v1036_v43 }
 0x789   :  { %v1466_v14 = vpop.f32.mrb[24].mxu0  ;;  %1574 = vmatpush3.bf16.msra.mxu1 %v1573_v31 }
 0x78a   :  { %v1046_v24 = vpop.f32.mrb[25].mxu0  ;;  %1575 = vmatprep.subr.bf16.mxu1 %v1700_v12 }
 0x78b   :  { %v1576_v39 = vpack.c.bf16 %v1466_v14, %v1046_v24 }
 0x78d   :  { %v1469_v38 = vpop.f32.mrb[26].mxu0  ;;  %1577 = vmatpush3.bf16.msra.mxu1 %v1576_v39 }
 0x78e   :  { %v1056_v18 = vpop.f32.mrb[27].mxu0  ;;  %1578 = vmatprep.subr.bf16.mxu1 %v1700_v12 }
 0x78f   :  { %v1579_v51 = vpack.c.bf16 %v1469_v38, %v1056_v18 }
 0x791   :  { %v1472_v33 = vpop.f32.mrb[28].mxu0  ;;  %1580 = vmatpush3.bf16.msra.mxu1 %v1579_v51 }
 0x792   :  { %v1066_v44 = vpop.f32.mrb[29].mxu0  ;;  %1581 = vmatprep.subr.bf16.mxu1 %v1700_v12 }
 0x793   :  { %v1582_v57 = vpack.c.bf16 %v1472_v33, %v1066_v44 }
 0x795   :  { %v1475_v58 = vpop.f32.mrb[30].mxu0  ;;  %1583 = vmatpush3.bf16.msra.mxu1 %v1582_v57 }
 0x796   :  { %v1076_v61 = vpop.f32.mrb[31].mxu0  ;;  %1584 = vmatprep.subr.bf16.mxu1 %v1700_v12 }
 0x797   :  { %v1585_v63 = vpack.c.bf16 %v1475_v58, %v1076_v61 }
 0x799   :  { %v1478_v0 = vpop.f32.mrb[32].mxu0  ;;  %1586 = vmatpush3.bf16.msra.mxu1 %v1585_v63 }
 0x79a   :  { %v1086_v1 = vpop.f32.mrb[33].mxu0  ;;  %1587 = vmatprep.subr.bf16.mxu1 %v1700_v12 }
 0x79b   :  { %v1588_v2 = vpack.c.bf16 %v1478_v0, %v1086_v1 }
 0x79d   :  { %1589 = vmatpush3.bf16.msra.mxu1 %v1588_v2 }
 0x7a0   :  { %1512 = vmatmul.mubr.msk.f32.vlgmr.msra.gmra.mrb[2].mxu1 %vm1101_vm6, %v1707_v6 }
 0x873   :  { %v1173_v34 = vpop.f32.mrb[2].mxu1 }
 0x874   :  { %v1174_v42 = vadd.f32 %v1237_v46, %v1173_v34  ;;  %v1513_v3 = vpop.f32.mrb[3].mxu1 }
 0x876   :  { %v1239_v4 = vmul.f32 -1.442695, %v1174_v42 }
 0x878   :  { %1696 = vpow2.f32 %v1239_v4 }
 0x882   :  { %v1697_v47 = vpop.eup %1696 }
 0x883   :  { %v1180_v12 = vadd.f32 1.0, %v1697_v47 }
 0x885   :  { %1698 = vrcp.f32 %v1180_v12 }
 0x88f   :  { %v1699_v5 = vpop.eup %1698 }
 0x890   :  { %1184 = vst.msk [vmem:[%s2144_s3] sm:$0xf] %vm1183_vm7, %v1699_v5 }

</bundles_post_ra>
